<compile_context>
chip_gen: v5e
topology: v5e:2x2
jax: 0.10.0
libtpu: 0.0.40
codegen_flags: <defaults>
</compile_context>

<pallas_src>
import jax
import jax.numpy as jnp
from jax.experimental import pallas as pl
from jax.experimental.pallas import tpu as pltpu


def _interp_matrix_bilinear(out_size, in_size, dtype=jnp.float32):
    """1-D interpolation weights matching
    F.interpolate(mode='bilinear'/'linear', align_corners=False, antialias=False)."""
    i = jnp.arange(out_size, dtype=jnp.float32)
    scale = in_size / out_size
    src = (i + 0.5) * scale - 0.5            # half-pixel source coordinate
    src = jnp.maximum(src, 0.0)              # PyTorch clamps negatives
    i0 = jnp.minimum(jnp.floor(src), in_size - 1)
    frac = src - i0
    i0i = i0.astype(jnp.int32)
    i1i = jnp.minimum(i0i + 1, in_size - 1)
    w = (jax.nn.one_hot(i0i, in_size, dtype=jnp.float32) * (1.0 - frac)[:, None]
         + jax.nn.one_hot(i1i, in_size, dtype=jnp.float32) * frac[:, None])
    return w.astype(dtype)


def _pick_h_block(H_out, max_rows=256):
    """Tile H_out only when large.  Tiles are multiples of 8 (output block
    (8,128)-legal); max_rows=256 keeps the f32 stage-1 intermediate small
    enough to stay out of spill/vst pressure on v5e."""
    if H_out <= max_rows:
        return H_out
    start = max_rows - max_rows % 8
    for d in range(start, 7, -8):
        if H_out % d == 0:
            return d
    # No multiple-of-8 divisor <= max_rows: keep the row dim untiled.
    # TODO(synk): pad H_out to a multiple of 8 (Wh rows + padded output,
    # sliced in the wrapper) for awkward large H_out values.
    return H_out


def _pick_channel_block(C, H_in, W_in, th, W_out, xsz, *,
                        min_channel_steps=2, target_block_bytes=1 << 20,
                        max_cb=32):
    """Channels folded per grid step: big enough to amortize the ~0.35us/step
    grid overhead and make large contiguous DMA blocks (~1 MiB), but keep
    >= 2 channel grid steps so a dual-TensorCore v7x chip can shard the
    'parallel' axis (on single-TC v5e/v6e the extra step is noise)."""
    if C <= 1:
        return 1
    upper = C if min_channel_steps <= 1 else max(1, C // min_channel_steps)
    per_ch = max(1, (H_in * W_in + th * W_out) * xsz)
    want = max(1, min(upper, max_cb, target_block_bytes // per_ch))
    for d in range(want, 0, -1):
        if C % d == 0:
            return d
    return 1


def _make_resize_kernel(cb, th, slice_wh):
    def kernel(x_ref, wh_ref, wwt_ref, o_ref):
        # x_ref:   (cb, H_in, W_in)   native-layout channel block
        # wh_ref:  (H_out, H_in) resident  [or (th, H_in) tile when not resident]
        # wwt_ref: (W_in, W_out)      column-interpolation matrix (fetched once)
        # o_ref:   (cb, th, W_out)    native-layout output block
        if slice_wh:
            h0 = pl.multiple_of(pl.program_id(1) * th, th)
            wh = wh_ref[pl.ds(h0, th), :]
        else:
            wh = wh_ref[...]
        wwt = wwt_ref[...]
        for c in range(cb):                      # static unroll over channels
            xc = x_ref[c].astype(wh.dtype)
            tmp = jnp.dot(wh, xc, preferred_element_type=jnp.float32)
            oc = jnp.dot(tmp.astype(wwt.dtype), wwt,
                         preferred_element_type=jnp.float32)
            o_ref[c] = oc.astype(o_ref.dtype)
    return kernel


def resize_v14(x, size, interpolation="bilinear", align_corners=False, *,
               weight_dtype=None, channel_block=None, h_out_block=None):
    """Pallas equivalent of ResizeV14(size).forward(x) for x of shape (C, H, W)."""
    assert interpolation == "bilinear"
    # TODO(synk): only 'bilinear' (align_corners=False, antialias=False — what
    # the module's forward hardcodes) is implemented; nearest/bicubic/area are not.
    C, H_in, W_in = x.shape
    H_out, W_out = size

    if weight_dtype is None:
        # Perf default: bf16 interpolation weights (weights are in [0,1]) run
        # the MXU at full rate and halve weight HBM/VMEM bytes; f32 accumulation
        # is kept via preferred_element_type.  Pass weight_dtype=jnp.float32
        # for bit-tight f32 semantics (~1e-2 relative divergence otherwise).
        weight_dtype = jnp.bfloat16

    xsz = x.dtype.itemsize
    wsz = jnp.dtype(weight_dtype).itemsize

    th = h_out_block if h_out_block is not None else _pick_h_block(H_out)
    assert H_out % th == 0 and (th == H_out or th % 8 == 0), (H_out, th)
    n_th = H_out // th

    cb = (channel_block if channel_block is not None
          else _pick_channel_block(C, H_in, W_in, th, W_out, xsz))
    assert C % cb == 0, (C, cb)
    n_cb = C // cb

    # Interpolation matrices (cheap JAX glue, built once).
    wh = _interp_matrix_bilinear(H_out, H_in, weight_dtype)          # (H_out, H_in)
    wwt = _interp_matrix_bilinear(W_out, W_in, weight_dtype).T       # (W_in, W_out)

    # Keep Wh fully resident (constant index_map -> fetched from HBM once) unless
    # it is huge, in which case fall back to per-tile streaming.
    wh_resident = (n_th == 1) or (H_out * H_in * wsz) <= (8 << 20)
    slice_wh = wh_resident and n_th > 1
    if wh_resident:
        wh_spec = pl.BlockSpec((H_out, H_in), lambda c, h: (0, 0))
    else:
        wh_spec = pl.BlockSpec((th, H_in), lambda c, h: (h, 0))

    # Conservative VMEM working-set estimate (double buffers included).
    est = (2 * cb * H_in * W_in * xsz                                 # x block
           + 2 * cb * th * W_out * xsz                                # out block
           + 2 * (H_out if wh_resident else th) * H_in * wsz          # Wh
           + 2 * W_in * W_out * wsz)                                  # Ww^T
    # Only raise the scoped-VMEM cap when needed, and never request more than
    # 48 MiB (leaves headroom on v7x's 64 MiB physical VMEM).
    vmem_limit = None if est <= 12 * 2**20 else min(int(est * 3 // 2), 48 * 2**20)

    out = pl.pallas_call(
        _make_resize_kernel(cb, th, slice_wh),
        out_shape=jax.ShapeDtypeStruct((C, H_out, W_out), x.dtype),
        grid_spec=pltpu.PrefetchScalarGridSpec(
            num_scalar_prefetch=0,
            grid=(n_cb, n_th),                    # H_out tiles inner: x block index
            in_specs=[                            # is constant there -> fetched once
                pl.BlockSpec((cb, H_in, W_in), lambda c, h: (c, 0, 0)),
                wh_spec,
                pl.BlockSpec((W_in, W_out), lambda c, h: (0, 0)),
            ],
            out_specs=pl.BlockSpec((cb, th, W_out), lambda c, h: (c, h, 0)),
        ),
        compiler_params=pltpu.CompilerParams(
            dimension_semantics=("parallel", "parallel"),
            vmem_limit_bytes=vmem_limit,
        ),
    )(x, wh, wwt)
    return out


if __name__ == "__main__":
    key = jax.random.PRNGKey(0)
    C, H, W = 4, 16, 16
    size = (24, 20)                      # target (H_out, W_out): up-sample

    x = jax.random.normal(key, (C, H, W), dtype=jnp.float32)

    # Pure-JAX reference using the same separable formulation (f32 weights).
    wh_ref = _interp_matrix_bilinear(size[0], H, jnp.float32)
    ww_ref = _interp_matrix_bilinear(size[1], W, jnp.float32)
    ref = jnp.einsum("oh,chw,pw->cop", wh_ref, x, ww_ref)

    # 1) Explicit f32-weight path: tight check.
    out_f32 = jax.block_until_ready(
        jax.jit(lambda a: resize_v14(a, size, weight_dtype=jnp.float32))(x))
    assert out_f32.shape == (C, size[0], size[1]), out_f32.shape
    assert jnp.allclose(out_f32, ref, atol=1e-5, rtol=1e-5), float(
        jnp.max(jnp.abs(out_f32 - ref)))

    # 2) Default path (bf16 weights on the MXU): looser tolerance vs f32 reference.
    out_bf = jax.block_until_ready(jax.jit(lambda a: resize_v14(a, size))(x))
    assert out_bf.shape == (C, size[0], size[1]), out_bf.shape
    assert jnp.allclose(out_bf, ref, atol=0.1, rtol=0.05), float(
        jnp.max(jnp.abs(out_bf - ref)))

    print("KERNEL_OK")
</pallas_src>

<mosaic_0001>
module attributes {stable_mosaic.version = 11 : i64} {
  func.func @kernel(%arg0: i32, %arg1: i32, %arg2: memref<2x16x16xf32, #tpu.memory_space<vmem>>, %arg3: memref<24x16xf32, #tpu.memory_space<vmem>>, %arg4: memref<16x20xf32, #tpu.memory_space<vmem>>, %arg5: memref<2x24x20xf32, #tpu.memory_space<vmem>>) attributes {dimension_semantics = [#tpu.dimension_semantics<parallel>, #tpu.dimension_semantics<parallel>], iteration_bounds = array<i64: 2, 1>, scalar_prefetch = 0 : i64, scratch_operands = 0 : i64, tpu.core_type = #tpu.core_type<tc>, window_params = [{transform_indices = @transform_0, window_bounds = array<i64: 2, 16, 16>}, {pipeline_mode = #tpu.pipeline_mode<synchronous>, transform_indices = @transform_1, window_bounds = array<i64: 24, 16>}, {pipeline_mode = #tpu.pipeline_mode<synchronous>, transform_indices = @transform_2, window_bounds = array<i64: 16, 20>}, {transform_indices = @transform_3, window_bounds = array<i64: 2, 24, 20>}]} {
    %c0 = arith.constant 0 : index
    %c0_0 = arith.constant 0 : index
    %0 = vector.load %arg3[%c0, %c0_0] : memref<24x16xf32, #tpu.memory_space<vmem>>, vector<24x16xf32>
    %c0_1 = arith.constant 0 : index
    %c0_2 = arith.constant 0 : index
    %1 = vector.load %arg4[%c0_1, %c0_2] : memref<16x20xf32, #tpu.memory_space<vmem>>, vector<16x20xf32>
    %c0_3 = arith.constant 0 : index
    %c0_4 = arith.constant 0 : index
    %c0_5 = arith.constant 0 : index
    %2 = vector.load %arg2[%c0_3, %c0_4, %c0_5] : memref<2x16x16xf32, #tpu.memory_space<vmem>>, vector<1x16x16xf32>
    %3 = vector.shape_cast %2 : vector<1x16x16xf32> to vector<16x16xf32>
    %cst = arith.constant dense<0.000000e+00> : vector<24x16xf32>
    %4 = tpu.matmul %0, %3, %cst {dimension_numbers = #tpu.dot_dimension_numbers<[1], [0], [0], [1], [0, 0, 1, 1], [], []>} : vector<24x16xf32>, vector<16x16xf32>, vector<24x16xf32> -> vector<24x16xf32>
    %cst_6 = arith.constant dense<0.000000e+00> : vector<24x20xf32>
    %5 = tpu.matmul %4, %1, %cst_6 {dimension_numbers = #tpu.dot_dimension_numbers<[1], [0], [0], [1], [0, 0, 1, 1], [], []>} : vector<24x16xf32>, vector<16x20xf32>, vector<24x20xf32> -> vector<24x20xf32>
    %c0_7 = arith.constant 0 : index
    %c0_8 = arith.constant 0 : index
    %c0_9 = arith.constant 0 : index
    %6 = vector.load %arg5[%c0_7, %c0_8, %c0_9] : memref<2x24x20xf32, #tpu.memory_space<vmem>>, vector<1x24x20xf32>
    %7 = vector.shape_cast %6 : vector<1x24x20xf32> to vector<24x20xf32>
    %8 = vector.shape_cast %5 : vector<24x20xf32> to vector<1x24x20xf32>
    tpu.vector_store %arg5[%c0_7, %c0_8, %c0_9], %8 {strides = array<i32>} : memref<2x24x20xf32, #tpu.memory_space<vmem>>, vector<1x24x20xf32>,
    %c1 = arith.constant 1 : index
    %c0_10 = arith.constant 0 : index
    %c0_11 = arith.constant 0 : index
    %9 = vector.load %arg2[%c1, %c0_10, %c0_11] : memref<2x16x16xf32, #tpu.memory_space<vmem>>, vector<1x16x16xf32>
    %10 = vector.shape_cast %9 : vector<1x16x16xf32> to vector<16x16xf32>
    %cst_12 = arith.constant dense<0.000000e+00> : vector<24x16xf32>
    %11 = tpu.matmul %0, %10, %cst_12 {dimension_numbers = #tpu.dot_dimension_numbers<[1], [0], [0], [1], [0, 0, 1, 1], [], []>} : vector<24x16xf32>, vector<16x16xf32>, vector<24x16xf32> -> vector<24x16xf32>
    %cst_13 = arith.constant dense<0.000000e+00> : vector<24x20xf32>
    %12 = tpu.matmul %11, %1, %cst_13 {dimension_numbers = #tpu.dot_dimension_numbers<[1], [0], [0], [1], [0, 0, 1, 1], [], []>} : vector<24x16xf32>, vector<16x20xf32>, vector<24x20xf32> -> vector<24x20xf32>
    %c1_14 = arith.constant 1 : index
    %c0_15 = arith.constant 0 : index
    %c0_16 = arith.constant 0 : index
    %13 = vector.load %arg5[%c1_14, %c0_15, %c0_16] : memref<2x24x20xf32, #tpu.memory_space<vmem>>, vector<1x24x20xf32>
    %14 = vector.shape_cast %13 : vector<1x24x20xf32> to vector<24x20xf32>
    %15 = vector.shape_cast %12 : vector<24x20xf32> to vector<1x24x20xf32>
    tpu.vector_store %arg5[%c1_14, %c0_15, %c0_16], %15 {strides = array<i32>} : memref<2x24x20xf32, #tpu.memory_space<vmem>>, vector<1x24x20xf32>,
    return
  }
  func.func @transform_0(%arg0: i32, %arg1: i32) -> (i32, i32, i32) {
    %c0_i32 = arith.constant 0 : i32
    %c0_i32_0 = arith.constant 0 : i32
    %c0_i32_1 = arith.constant 0 : i32
    return %arg0, %c0_i32, %c0_i32_0 : i32, i32, i32
  }
  func.func @transform_1(%arg0: i32, %arg1: i32) -> (i32, i32) {
    %c0_i32 = arith.constant 0 : i32
    %c0_i32_0 = arith.constant 0 : i32
    %c0_i32_1 = arith.constant 0 : i32
    return %c0_i32, %c0_i32_0 : i32, i32
  }
  func.func @transform_2(%arg0: i32, %arg1: i32) -> (i32, i32) {
    %c0_i32 = arith.constant 0 : i32
    %c0_i32_0 = arith.constant 0 : i32
    %c0_i32_1 = arith.constant 0 : i32
    return %c0_i32, %c0_i32_0 : i32, i32
  }
  func.func @transform_3(%arg0: i32, %arg1: i32) -> (i32, i32, i32) {
    %c0_i32 = arith.constant 0 : i32
    %c0_i32_0 = arith.constant 0 : i32
    return %arg0, %arg1, %c0_i32 : i32, i32, i32
  }
}

</mosaic_0001>

<bundles_post_ra>
// kernel: _lambda_.1
= control target key start
LH: loop header
LB: loop body
LE: loop exit
PB: predicated region body
PF: predicated region fallthrough
CT: control target
= control target key end

     0   :  { %8 = vsyncpa [#allocation3], 0  ;;  %s775_s0 = inlined_call_operand.hbm [shape: f32[4,16,16], index: 0, kind: input, shape index: {}]   ;;  %s776_s1 = inlined_call_operand.vmem [shape: f32[24,16], index: 1, kind: input, shape index: {}]   ;;  %s777_s2 = inlined_call_operand.vmem [shape: f32[16,20], index: 2, kind: input, shape index: {}]   ;;  %s778_s3 = inlined_call_operand.vmem [shape: f32[4,24,20], index: 3, kind: output, shape index: {}]  }
   0x1   :  { %10 = vsyncpa [#allocation3 + $0x1], 0  ;;  %s661_s12 = smov 0   ;;  %s663_s13 = smov 0  }
   0x2   :  { %s665_s14 = smov 0   ;;  %s667_s15 = smov 0  }
   0x3   :  { %s669_s16 = smov 0   ;;  %s671_s17 = smov 0  }
   0x4 LB: > { %s466_s18 = sadd.s32 4294967295, %s637_s17   ;;  %s28_s19 = sadd.s32 1, %s633_s16  ;;  %s637_s17 = sphi %s671_s17, %s16_s17   ;;  %s633_s16 = sphi %s669_s16, %s785_s16   ;;  %s629_s15 = sphi %s667_s15, %s784_s15   ;;  %s625_s14 = sphi %s665_s14, %s783_s14   ;;  %s621_s13 = sphi %s663_s13, %s782_s13   ;;  %s617_s12 = sphi %s661_s12, %s781_s12  }
   0x5   : > { %p30_p0 = scmp.ge.s32.totalorder %s28_s19, 2  ;;  %s35_s20 = sadd.s32 1, %s625_s14 }
   0x6   : > { %p42_p1 = scmp.ne.s32.totalorder %s625_s14, %s621_s13  ;;  %p43_p2 = scmp.eq.s32.totalorder %s637_s17, 0 }
   0x7   : > { %s787_s19 = smov (%p30_p0, %s28_s19), 0  ;;  %p48_p4 = scmp.ne.s32.totalorder %s621_s13, %s617_s12 }
   0x8   : > { %p697_p3 = por %p43_p2, %p42_p1  ;;  %s32_s22 = ssub.s32 %s633_s16, %s787_s19 }
   0x9   : > { %p49_p5 = scmp.eq.s32.totalorder %s466_s18, 0  ;;  %p33_p6 = scmp.eq.s32.totalorder %s32_s22, 0 }
   0xa   : > { %p506_p8 = scmp.lt.s32.totalorder %s637_s17, 2  ;;  %s148_s25 = sand.u32 1, %s625_s14  }
   0xb   : > { %p704_p7 = por %p49_p5, %p48_p4  ;;  %s498_s26 = sshll.u32 %s633_s16, 5 }
   0xc   : > { %s710_s24 = scalar_select %p33_p6, %s625_s14, %s35_s20  }
   0xd   : > { %s470_s27 = sshll.u32 %s148_s25, 5  ;;  %s158_s30 = scalar_lea.hbm %s775_s0, %s498_s26 }
   0xe   : > { %s159_s4 = sshll.u32 %s158_s30, 4  ;;  %s152_s5 = scalar_lea.vmem [#allocation2], %s470_s27  ;;  %s160_s4 = int_to_ptr.hbm [resolvable:$true] %s159_s4 }
   0xf   : > { %s161_s6 = sshll.u32 %s152_s5, 4  ;;  %p503_p9 = pnand %p506_p8, %p697_p3  ;;  %s162_s6 = int_to_ptr.vmem [resolvable:$true] %s161_s6 }
  0x10   : > { %p474_p10 = scmp.ge.s32.totalorder %s637_s17, 1  ;;  %p169_p11 = scmp.lt.s32.totalorder %s637_s17, 3 }
  0x11   : > { %s149_s7 = scalar_lea.sflag [#allocation3], %s148_s25  ;;  %s639_s8 = smov 128  }
  0x12   : > { %s640_s9 = smov 8   ;;  %p170_p12 = pnand %p474_p10, %p169_p11 }
  0x13   : > { %505 = dma.hbm_to_vmem [thread:$0]  (!%p503_p9), %s160_s4, 512, %s162_s6, %s149_s7, %s639_s8, %s639_s8, %s640_s9  }
  0x14   : > { %173 = sbr.rel (%p170_p12) target bundleno = 311 (0x137), region = 32  ;;  %s175_s10 = sand.u32 (!%p170_p12), 1, %s621_s13  }
  0x15   : > { %s475_s11 = sshll.u32 (!%p170_p12), %s175_s10, 5  ;;  %s176_s12 = scalar_lea.sflag (!%p170_p12), [#allocation3], %s175_s10 }
  0x16   : > { %s179_s18 = scalar_lea.vmem (!%p170_p12), [#allocation2], %s475_s11 }
  0x19   : > { %612 = dma.done.wait (%p704_p7), %s176_s12, 512  }
  0x1a   : > { %614 = vsyncadd (%p704_p7), %s176_s12, 4294966784  ;;  %v485_v0 = vld [vmem:[%s179_s18 + $0x18] sm:$0xff]  ;;  %v484_v1 = vld [vmem:[%s179_s18 + $0x10] sm:$0xff]  ;;  %vm228_vm0 = vcmask 130048   ;;  %s476_s4 = sshll.u32 %s629_s15, 1  ;;  %vm299_vm1 = vcmask 162816  }
  0x1b   : > { %320 = vmatpush.msra.mxu2 %v485_v0  ;;  %v221_v2 = vld [vmem:[%s776_s1] sm:$0xff]  ;;  %v227_v3 = vld [vmem:[%s179_s18 + $0x8] sm:$0xff]  ;;  %v223_v7 = vld [vmem:[%s776_s1 + $0x10] sm:$0xff]  ;;  %p211_p13 = scmp.lt.s32.totalorder %s476_s4, 3 }
  0x1c   : > { %v226_v4 = vld [vmem:[%s179_s18] sm:$0xff]  ;;  %252 = vmatpush.msra.mxu0 %v227_v3  ;;  %v225_v5 = vld [vmem:[%s777_s2 + $0x8] sm:$0xff] }
  0x1d   : > { %321 = vmatpush.msra.mxu2 %v484_v1  ;;  %355 = vmatpush.msra.mxu3 %v225_v5  ;;  %v222_v6 = vld [vmem:[%s776_s1 + $0x8] sm:$0xff]  ;;  %v224_v8 = vld [vmem:[%s777_s2] sm:$0xff]  ;;  %s789_s4 = smov (!%p211_p13, %s476_s4), 3 }
  0x1e   : > { %486 = vmatmul.msk.f32.vlgmr.msra.gmra.mxu2 %vm228_vm0, %v221_v2  ;;  %253 = vmatpush.msra.mxu0 %v226_v4  ;;  %s499_s5 = smul.u32 24, %s789_s4 }
  0x1f   : > { %478 = vmatmul.msk.f32.vlgmr.msra.gmra.mxu0 %vm228_vm0, %v221_v2  ;;  %287 = vmatpush.msra.mxu1 %v225_v5 }
  0x20   : > { %356 = vmatpush.msra.mxu3 %v224_v8  ;;  %s218_s8 = scalar_lea.vmem %s778_s3, %s499_s5 }
  0x21   : > { %288 = vmatpush.msra.mxu1 %v224_v8 }
  0x26   : > { %487 = vmatmul.msk.f32.gmra.mxu2 %vm228_vm0, %v222_v6 }
  0x27   : > { %479 = vmatmul.msk.f32.gmra.mxu0 %vm228_vm0, %v222_v6 }
  0x2e   : > { %488 = vmatmul.msk.f32.gmra.mxu2 %vm228_vm0, %v223_v7 }
  0x2f   : > { %480 = vmatmul.msk.f32.gmra.mxu0 %vm228_vm0, %v223_v7 }
  0x9c   : > { %v255_v9 = vpop.f32.mrf.mxu0 }
  0x9d   : > { %481 = vmatmul.msk.f32.vlgmr.msra.gmra.mxu1 %vm228_vm0, %v255_v9 }
  0xa1   : > { %v323_v10 = vpop.f32.mrf.mxu2 }
  0xa2   : > { %489 = vmatmul.msk.f32.vlgmr.msra.gmra.mxu3 %vm228_vm0, %v323_v10 }
  0xa4   : > { %v258_v11 = vpop.f32.mrf.mxu0 }
  0xa5   : > { %482 = vmatmul.msk.f32.gmra.mxu1 %vm228_vm0, %v258_v11 }
  0xa9   : > { %v326_v12 = vpop.f32.mrf.mxu2 }
  0xaa   : > { %490 = vmatmul.msk.f32.gmra.mxu3 %vm228_vm0, %v326_v12 }
  0xac   : > { %v261_v13 = vpop.f32.mrf.mxu0 }
  0xad   : > { %483 = vmatmul.msk.f32.gmra.mxu1 %vm228_vm0, %v261_v13 }
  0xb1   : > { %v329_v14 = vpop.f32.mrf.mxu2 }
  0xb2   : > { %491 = vmatmul.msk.f32.gmra.mxu3 %vm228_vm0, %v329_v14 }
 0x11a   : > { %v290_v15 = vpop.f32.mrf.mxu1 }
 0x11b   : > { %300 = vst.msk [vmem:[%s218_s8] sm:$0xff] %vm299_vm1, %v290_v15 }
 0x122   : > { %v293_v16 = vpop.f32.mrf.mxu1 }
 0x123   : > { %301 = vst.msk [vmem:[%s218_s8 + $0x8] sm:$0xff] %vm299_vm1, %v293_v16 }
 0x125   : > { %v358_v17 = vpop.f32.mrf.mxu3 }
 0x126   : > { %492 = vst.msk [vmem:[%s218_s8 + $0x18] sm:$0xff] %vm299_vm1, %v358_v17 }
 0x12a   : > { %v296_v18 = vpop.f32.mrf.mxu1 }
 0x12b   : > { %302 = vst.msk [vmem:[%s218_s8 + $0x10] sm:$0xff] %vm299_vm1, %v296_v18 }
 0x12d   : > { %v361_v19 = vpop.f32.mrf.mxu3 }
 0x12e   : > { %493 = vst.msk [vmem:[%s218_s8 + $0x20] sm:$0xff] %vm299_vm1, %v361_v19 }
 0x135   : > { %v364_v20 = vpop.f32.mrf.mxu3 }
 0x136   : > { %494 = vst.msk [vmem:[%s218_s8 + $0x28] sm:$0xff] %vm299_vm1, %v364_v20 }
 0x137 PF: > { %s16_s17 = sadd.s32 1, %s637_s17   ;;  %s781_s12 = smov %s621_s13 }
 0x138   : > { %p13_p0 = scmp.ge.s32.totalorder %s16_s17, 4   ;;  %s782_s13 = smov %s625_s14 }
 0x139   : > { %s783_s14 = smov %s710_s24  ;;  %s784_s15 = smov %s633_s16 }
 0x13a   : > { %s785_s16 = smov %s787_s19  ;;  %15 = sbr.rel (!%p13_p0) target bundleno = 4 (0x4), region = 74 }
 0x13f   :  { %404 = vsyncpa [#allocation3], 1 }
 0x140   :  { %406 = vsyncpa [#allocation3 + $0x1], 1 }

</bundles_post_ra>
